<compile_context>
chip_gen: v7x
topology: tpu7x:2x2x1
jax: 0.10.0
libtpu: 0.0.40
codegen_flags: <defaults>
</compile_context>

<pallas_src>
import jax
import jax.numpy as jnp
from jax.experimental import pallas as pl
from jax.experimental.pallas import tpu as pltpu


def _edge_decoder_kernel(zcat_ref, w1_ref, b1_ref, w2_ref, b2_ref, out_ref):
    # zcat_ref: [2H, TE] bf16   w1_ref: [H, 2H] bf16 (torch layout, used directly)
    # b1_ref:   [H, 1]  f32     w2_ref: [H, 1]  f32   b2_ref: [1] f32 (SMEM)
    # out_ref:  [1, TE] f32
    h = jnp.dot(w1_ref[...], zcat_ref[...],
                preferred_element_type=jnp.float32)          # [H, TE] f32 (MXU)
    h = jnp.maximum(h + b1_ref[...], 0.0)                    # lin1 bias + relu (VPU)
    # TODO(synk): BatchNorm1d / Dropout branches (use_batchnorm / use_dropout)
    # are not implemented; the default-constructed module disables both.
    o = jnp.sum(h * w2_ref[...], axis=0, keepdims=True)      # lin2 as VPU mul + XLU reduce
    o = o + b2_ref[0]
    out_ref[...] = jnp.maximum(o, 0.0)                       # final .relu()


def edge_decoder_pallas(z_src_nodes, z_dst_nodes, edge_label_index,
                        w1, b1, w2, b2, *, tile_e=None):
    """z_src_nodes: [N_from, H], z_dst_nodes: [N_to, H]
       edge_label_index: int32 [2, E]
       w1: [H, 2H] (torch layout: out x in), b1: [H], w2: [1, H], b2: [1]
       returns [E, 1] float32
    """
    H = z_src_nodes.shape[1]
    row, col = edge_label_index[0], edge_label_index[1]
    E = int(row.shape[0])

    # Glue: gather per-edge embeddings (contiguous row gather), concat, cast to
    # bf16 and transpose once to a feature-major [2H, E] stream (single input).
    # TODO(synk): for E >> N the gather could be fused into the kernel via
    # scalar-prefetched indices + manual DMA; not done here.
    zcat = jnp.concatenate(
        [jnp.take(z_src_nodes, row, axis=0),
         jnp.take(z_dst_nodes, col, axis=0)], axis=-1)        # [E, 2H]
    zcat = zcat.astype(jnp.bfloat16).T                        # [2H, E] bf16

    # Edge-tile size: multiple of 128 lanes, sized so a double-buffered input
    # tile stays under ~2 MiB (well inside the scoped-VMEM limit), capped at 8K.
    if tile_e is None:
        tile_e = max(512, min(8192, (2 * 1024 * 1024) // (2 * H * 2)))
        tile_e = (tile_e // 128) * 128
    TE = max(128, min(int(tile_e), pl.cdiv(E, 128) * 128))
    E_pad = pl.cdiv(E, TE) * TE
    if E_pad != E:
        zcat = jnp.pad(zcat, ((0, 0), (0, E_pad - E)))

    w1_b = w1.astype(jnp.bfloat16)                            # [H, 2H]
    b1_c = b1.reshape(H, 1).astype(jnp.float32)               # [H, 1]
    w2_c = w2.reshape(H, 1).astype(jnp.float32)               # [H, 1]
    b2_c = b2.reshape(1).astype(jnp.float32)                  # [1]  (SMEM scalar)

    grid = (E_pad // TE,)
    flops = 2 * E_pad * (2 * H) * H + 3 * E_pad * H
    bytes_accessed = (zcat.size * 2 + E_pad * 4
                      + w1_b.size * 2 + (b1_c.size + w2_c.size + 1) * 4)

    out = pl.pallas_call(
        _edge_decoder_kernel,
        out_shape=jax.ShapeDtypeStruct((1, E_pad), jnp.float32),
        grid=grid,
        in_specs=[
            pl.BlockSpec((2 * H, TE), lambda i: (0, i)),      # streamed edge features
            pl.BlockSpec((H, 2 * H), lambda i: (0, 0)),       # w1 (VMEM-resident)
            pl.BlockSpec((H, 1), lambda i: (0, 0)),           # b1
            pl.BlockSpec((H, 1), lambda i: (0, 0)),           # w2 column
            pl.BlockSpec(memory_space=pltpu.MemorySpace.SMEM),  # b2 scalar
        ],
        out_specs=pl.BlockSpec((1, TE), lambda i: (0, i)),    # lane-dense output strip
        compiler_params=pltpu.CompilerParams(
            dimension_semantics=("parallel",),
            vmem_limit_bytes=32 * 1024 * 1024,
        ),
        cost_estimate=pl.CostEstimate(flops=flops, transcendentals=0,
                                      bytes_accessed=bytes_accessed),
    )(zcat, w1_b, b1_c, w2_c, b2_c)

    return out[0, :E].reshape(E, 1)


def _reference(z_src_nodes, z_dst_nodes, edge_label_index, w1, b1, w2, b2):
    row, col = edge_label_index[0], edge_label_index[1]
    z = jnp.concatenate([z_src_nodes[row], z_dst_nodes[col]], axis=-1)
    z = jnp.maximum(z @ w1.T + b1, 0.0)
    z = jnp.maximum(z @ w2.T + b2, 0.0)
    return z


if __name__ == "__main__":
    H = 32          # hidden_channels
    N_FROM = 16     # nodes of type link_type[0]
    N_TO = 12       # nodes of type link_type[1]
    E = 8           # number of edges to score

    key = jax.random.PRNGKey(0)
    k = jax.random.split(key, 7)

    # Deterministic synthetic parameters (nn.Linear(2H,H), nn.Linear(H,1) shapes).
    w1 = jax.random.normal(k[0], (H, 2 * H), jnp.float32) * 0.1
    b1 = jax.random.normal(k[1], (H,), jnp.float32) * 0.1
    w2 = jax.random.normal(k[2], (1, H), jnp.float32) * 0.1
    b2 = jax.random.normal(k[3], (1,), jnp.float32) * 0.1

    # Synthetic z_dict entries and edge index.
    z_from = jax.random.normal(k[4], (N_FROM, H), jnp.float32)
    z_to = jax.random.normal(k[5], (N_TO, H), jnp.float32)
    rows = jax.random.randint(k[6], (E,), 0, N_FROM, jnp.int32)
    cols = jax.random.randint(jax.random.fold_in(key, 99), (E,), 0, N_TO, jnp.int32)
    edge_label_index = jnp.stack([rows, cols], axis=0)

    out = edge_decoder_pallas(z_from, z_to, edge_label_index, w1, b1, w2, b2)
    out = jax.block_until_ready(out)

    # Reference with the same bf16 input quantization the kernel streams.
    zf_q = z_from.astype(jnp.bfloat16).astype(jnp.float32)
    zt_q = z_to.astype(jnp.bfloat16).astype(jnp.float32)
    w1_q = w1.astype(jnp.bfloat16).astype(jnp.float32)
    ref = _reference(zf_q, zt_q, edge_label_index, w1_q, b1, w2, b2)

    assert out.shape == (E, 1)
    assert jnp.allclose(out, ref, atol=1e-3, rtol=1e-3), "mismatch vs reference"

    print("KERNEL_OK")
</pallas_src>

<mosaic_0001>
module attributes {stable_mosaic.version = 11 : i64} {
  func.func @_edge_decoder_kernel(%arg0: i32, %arg1: memref<64x128xbf16, #tpu.memory_space<vmem>>, %arg2: memref<32x64xbf16, #tpu.memory_space<vmem>>, %arg3: memref<32x1xf32, #tpu.memory_space<vmem>>, %arg4: memref<32x1xf32, #tpu.memory_space<vmem>>, %arg5: memref<1xf32, #tpu.memory_space<smem>>, %arg6: memref<1x128xf32, #tpu.memory_space<vmem>>) attributes {dimension_semantics = [#tpu.dimension_semantics<parallel>], iteration_bounds = array<i64: 1>, scalar_prefetch = 0 : i64, scratch_operands = 0 : i64, tpu.core_type = #tpu.core_type<tc>, window_params = [{transform_indices = @transform_0, window_bounds = array<i64: 64, 128>}, {pipeline_mode = #tpu.pipeline_mode<synchronous>, transform_indices = @transform_1, window_bounds = array<i64: 32, 64>}, {pipeline_mode = #tpu.pipeline_mode<synchronous>, transform_indices = @transform_2, window_bounds = array<i64: 32, 1>}, {pipeline_mode = #tpu.pipeline_mode<synchronous>, transform_indices = @transform_3, window_bounds = array<i64: 32, 1>}, {transform_indices = @transform_4, window_bounds = array<i64: 1>}, {transform_indices = @transform_5, window_bounds = array<i64: 1, 128>}]} {
    %c0 = arith.constant 0 : index
    %c0_0 = arith.constant 0 : index
    %0 = vector.load %arg2[%c0, %c0_0] : memref<32x64xbf16, #tpu.memory_space<vmem>>, vector<32x64xbf16>
    %c0_1 = arith.constant 0 : index
    %c0_2 = arith.constant 0 : index
    %1 = vector.load %arg1[%c0_1, %c0_2] : memref<64x128xbf16, #tpu.memory_space<vmem>>, vector<64x128xbf16>
    %cst = arith.constant dense<0.000000e+00> : vector<32x128xf32>
    %2 = tpu.matmul %0, %1, %cst {dimension_numbers = #tpu.dot_dimension_numbers<[1], [0], [0], [1], [0, 0, 1, 1], [], []>} : vector<32x64xbf16>, vector<64x128xbf16>, vector<32x128xf32> -> vector<32x128xf32>
    %c0_3 = arith.constant 0 : index
    %c0_4 = arith.constant 0 : index
    %3 = vector.load %arg3[%c0_3, %c0_4] : memref<32x1xf32, #tpu.memory_space<vmem>>, vector<32x1xf32>
    %4 = vector.broadcast %3 : vector<32x1xf32> to vector<32x128xf32>
    %5 = arith.addf %2, %4 : vector<32x128xf32>
    %cst_5 = arith.constant 0.000000e+00 : f32
    %6 = vector.broadcast %cst_5 : f32 to vector<32x128xf32>
    %7 = arith.maximumf %5, %6 : vector<32x128xf32>
    %c0_6 = arith.constant 0 : index
    %c0_7 = arith.constant 0 : index
    %8 = vector.load %arg4[%c0_6, %c0_7] : memref<32x1xf32, #tpu.memory_space<vmem>>, vector<32x1xf32>
    %9 = vector.broadcast %8 : vector<32x1xf32> to vector<32x128xf32>
    %10 = arith.mulf %7, %9 : vector<32x128xf32>
    %cst_8 = arith.constant dense<0.000000e+00> : vector<128xf32>
    %11 = vector.multi_reduction <add>, %10, %cst_8 [0] : vector<32x128xf32> to vector<128xf32>
    %12 = vector.shape_cast %11 : vector<128xf32> to vector<1x128xf32>
    %c0_9 = arith.constant 0 : index
    %13 = memref.load %arg5[%c0_9] : memref<1xf32, #tpu.memory_space<smem>>
    %14 = vector.broadcast %13 : f32 to vector<1x128xf32>
    %15 = arith.addf %12, %14 : vector<1x128xf32>
    %cst_10 = arith.constant 0.000000e+00 : f32
    %16 = vector.broadcast %cst_10 : f32 to vector<1x128xf32>
    %17 = arith.maximumf %15, %16 : vector<1x128xf32>
    %c0_11 = arith.constant 0 : index
    %c0_12 = arith.constant 0 : index
    %18 = vector.load %arg6[%c0_11, %c0_12] : memref<1x128xf32, #tpu.memory_space<vmem>>, vector<1x128xf32>
    tpu.vector_store %arg6[%c0_11, %c0_12], %17 {strides = array<i32>} : memref<1x128xf32, #tpu.memory_space<vmem>>, vector<1x128xf32>,
    return
  }
  func.func @transform_0(%arg0: i32) -> (i32, i32) {
    %c0_i32 = arith.constant 0 : i32
    %c0_i32_0 = arith.constant 0 : i32
    return %c0_i32, %arg0 : i32, i32
  }
  func.func @transform_1(%arg0: i32) -> (i32, i32) {
    %c0_i32 = arith.constant 0 : i32
    %c0_i32_0 = arith.constant 0 : i32
    %c0_i32_1 = arith.constant 0 : i32
    return %c0_i32, %c0_i32_0 : i32, i32
  }
  func.func @transform_2(%arg0: i32) -> (i32, i32) {
    %c0_i32 = arith.constant 0 : i32
    %c0_i32_0 = arith.constant 0 : i32
    %c0_i32_1 = arith.constant 0 : i32
    return %c0_i32, %c0_i32_0 : i32, i32
  }
  func.func @transform_3(%arg0: i32) -> (i32, i32) {
    %c0_i32 = arith.constant 0 : i32
    %c0_i32_0 = arith.constant 0 : i32
    %c0_i32_1 = arith.constant 0 : i32
    return %c0_i32, %c0_i32_0 : i32, i32
  }
  func.func @transform_4(%arg0: i32) -> i32 {
    %c0_i32 = arith.constant 0 : i32
    %c0_i32_0 = arith.constant 0 : i32
    return %c0_i32 : i32
  }
  func.func @transform_5(%arg0: i32) -> (i32, i32) {
    %c0_i32 = arith.constant 0 : i32
    %c0_i32_0 = arith.constant 0 : i32
    return %c0_i32, %arg0 : i32, i32
  }
}

</mosaic_0001>

<bundles_post_ra>
// kernel: tpu_custom_call.1
= control target key start
LH: loop header
LB: loop body
LE: loop exit
PB: predicated region body
PF: predicated region fallthrough
CT: control target
= control target key end

     0   :  { %v269_v2 = vmov 0   ;;  %vm93_vm0 = vcmask 523264   ;;  %s360_s0 = inlined_call_operand.vmem [shape: bf16[64,128], index: 0, kind: input, shape index: {}]   ;;  %s361_s1 = inlined_call_operand.vmem [shape: bf16[32,64], index: 1, kind: input, shape index: {}]   ;;  %s362_s2 = inlined_call_operand.vmem [shape: f32[32,1], index: 2, kind: input, shape index: {}]   ;;  %s363_s3 = inlined_call_operand.vmem [shape: f32[32,1], index: 3, kind: input, shape index: {}]   ;;  %s364_s4 = inlined_call_operand.<no memory space> [shape: f32[1], index: 4, kind: input, shape index: {}]   ;;  %s365_s5 = inlined_call_operand.hbm [shape: f32[1,128], index: 5, kind: output, shape index: {}]  }
   0x1   :  { %v239_v0 = vld [vmem:[%s360_s0] sm:$0xff]   ;;  %v240_v1 = vld [vmem:[%s360_s0 + $0x8] sm:$0xff]   ;;  %237 = vset.pattern.permute.xlu0 %v269_v2  ;;  %v241_v3 = vld [vmem:[%s360_s0 + $0x10] sm:$0xff]   ;;  %238 = vset.pattern.permute.xlu1 %v269_v2 }
   0x2   :  { %223 = vmatprep.subr.bf16.mxu0 %v239_v0  ;;  %v243_v4 = vld [vmem:[%s361_s1] sm:$0xff]   ;;  %v37_v6 = vld [vmem:[%s362_s2 + $0x10] sm:$0xff]  ;;  %v242_v7 = vld [vmem:[%s360_s0 + $0x18] sm:$0xff]  }
   0x3   :  { %224 = vmatpush3.bf16.msra.mxu0 %v239_v0  ;;  %231 = vmatprep.mubr.msk.bf16.mxu0 %vm93_vm0, %v243_v4  ;;  %v35_v5 = vld [vmem:[%s362_s2] sm:$0xff]  ;;  %v36_v8 = vld [vmem:[%s362_s2 + $0x8] sm:$0xff] }
   0x4   :  { %225 = vmatprep.subr.bf16.mxu0 %v240_v1  ;;  %41 = vperm.xlu0 %237, %v35_v5  }
   0x5   :  { %51 = vperm.xlu1 %238, %v37_v6  }
   0x7   :  { %226 = vmatpush3.bf16.msra.mxu0 %v240_v1 }
   0x8   :  { %227 = vmatprep.subr.bf16.mxu0 %v241_v3 }
   0x9   :  { %11 = vsyncpa [#allocation4], 0  ;;  %v38_v9 = vld [vmem:[%s362_s2 + $0x18] sm:$0xff]  ;;  %46 = vperm.xlu0 %237, %v36_v8   ;;  %v153_v10 = vld [vmem:[%s363_s3] sm:$0xff]  ;;  %v191_v47 = vstv %s364_s4  ;;  %s270_s19 = smov [#allocation3]  }
   0xa   :  { %56 = vperm.xlu1 %238, %v38_v9   ;;  %v154_v11 = vld [vmem:[%s363_s3 + $0x8] sm:$0xff]  ;;  %v155_v13 = vld [vmem:[%s363_s3 + $0x10] sm:$0xff]  ;;  %v156_v14 = vld [vmem:[%s363_s3 + $0x18] sm:$0xff]  ;;  %s201_s20 = sshll.u32 %s270_s19, 4  ;;  %s202_s20 = int_to_ptr.vmem [resolvable:$true] %s201_s20 }
   0xb   :  { %228 = vmatpush3.bf16.msra.mxu0 %v241_v3  ;;  %v244_v12 = vld [vmem:[%s361_s1 + $0x8] sm:$0xff]   ;;  %s245_s21 = scalar_lea.vmem %s202_s20, 16  ;;  %s249_s22 = scalar_lea.vmem %s202_s20, 32 }
   0xc   :  { %229 = vmatprep.subr.bf16.mxu0 %v242_v7  ;;  %p246_p0 = scmp.ne.s32.totalorder %s202_s20, %s245_s21  ;;  %p250_p1 = scmp.lt.s32.totalorder %s202_s20, %s202_s20 }
   0xd   :  { %159 = vperm.xlu0 %237, %v153_v10   ;;  %p251_p2 = scmp.lt.s32.totalorder %s249_s22, %s245_s21 }
   0xe   :  { %164 = vperm.xlu1 %238, %v154_v11  }
   0xf   :  { %230 = vmatpush3.bf16.msra.mxu0 %v242_v7  ;;  %p252_p3 = por %p251_p2, %p250_p1 }
  0x11   :  { %169 = vperm.xlu0 %237, %v155_v13   ;;  %p253_p4 = pnand %p252_p3, %p246_p0 }
  0x12   :  { %232 = vmatmul.mubr.msk.bf16.vlgmr.msra.gmra.mrb[0].mxu0 %vm93_vm0, %v244_v12  ;;  %174 = vperm.xlu1 %238, %v156_v14  }
  0x83   :  { %v42_v15 = vpop.permute.xlu0 %41 }
  0x84   :  { %v52_v16 = vpop.permute.xlu1 %51 }
  0x88   :  { %v47_v17 = vpop.permute.xlu0 %46 }
  0x89   :  { %v57_v18 = vpop.permute.xlu1 %56 }
  0x8c   :  { %v160_v24 = vpop.permute.xlu0 %159 }
  0x8d   :  { %v165_v29 = vpop.permute.xlu1 %164 }
  0x90   :  { %v170_v35 = vpop.permute.xlu0 %169 }
  0x91   :  { %v175_v38 = vpop.permute.xlu1 %174 }
  0xe5   :  { %v233_v19 = vpop.f32.mrb[0].mxu0 }
  0xe6   :  { %v134_v20 = vpop.f32.mrb[1].mxu0  ;;  %v143_v21 = vadd.f32 %v233_v19, %v52_v16 }
  0xe7   :  { %v135_v22 = vadd.f32 %v134_v20, %v42_v15  ;;  %v234_v23 = vpop.f32.mrb[2].mxu0 }
  0xe8   :  { %v137_v25 = vpop.f32.mrb[3].mxu0  ;;  %v146_v27 = vadd.f32 %v234_v23, %v57_v18  ;;  %v151_v30 = vmax.f32 %v143_v21, 0.0 }
  0xe9   :  { %v149_v26 = vmax.f32 %v135_v22, 0.0  ;;  %v138_v28 = vadd.f32 %v137_v25, %v47_v17 }
  0xea   :  { %v152_v33 = vmax.f32 %v146_v27, 0.0  ;;  %v179_v36 = vmul.f32 %v170_v35, %v151_v30 }
  0xeb   :  { %v150_v31 = vmax.f32 %v138_v28, 0.0  ;;  %v177_v32 = vmul.f32 %v160_v24, %v149_v26 }
  0xec   :  { %v180_v39 = vmul.f32 %v175_v38, %v152_v33 }
  0xed   :  { %v178_v34 = vmul.f32 %v165_v29, %v150_v31 }
  0xef   :  { %v181_v37 = vadd.f32 %v178_v34, %v177_v32 }
  0xf1   :  { %v182_v40 = vadd.f32 %v181_v37, %v179_v36 }
  0xf3   :  { %v183_v41 = vadd.f32 %v182_v40, %v180_v39 }
  0xf5   :  { %v184_v42 = vrot.slane %v183_v41, 4 }
  0xf7   :  { %v185_v43 = vadd.f32 %v184_v42, %v183_v41 }
  0xf9   :  { %v186_v44 = vrot.slane %v185_v43, 2 }
  0xfb   :  { %v187_v45 = vadd.f32 %v186_v44, %v185_v43 }
  0xfd   :  { %v188_v46 = vrot.slane %v187_v45, 1 }
  0xff   :  { %v189_v48 = vadd.f32 %v188_v46, %v187_v45 }
 0x101   :  { %v192_v49 = vadd.f32 %v191_v47, %v189_v48 }
 0x103   :  { %v193_v50 = vmax.f32 %v192_v49, 0.0 }
 0x105   :  { %194 = vst [vmem:[#allocation3] sm:$0x1] %v193_v50 }
 0x106   :  { %256 = shalt.err (!%p253_p4)
}
 0x107   :  { %s257_s25 = scalar_lea.hbm %s365_s5, 16 }
 0x108   :  { %p258_p5 = scmp.ne.s32.totalorder %s365_s5, %s257_s25  ;;  %p261_p6 = scmp.lt.u32.totalorder %s257_s25, %s365_s5 }
 0x10a   :  { %p263_p7 = pnand %p261_p6, %p258_p5 }
 0x10c   :  { %266 = shalt.err (!%p263_p7)
}
 0x10d   :  { %204 = dma.vmem_to_hbm [thread:$0]  %s202_s20, 16, %s365_s5, [#allocation4]  }
 0x10e   :  { %267 = dma.done.wait [#allocation4], 16  }
 0x10f   :  { %268 = vsyncadd [#allocation4], 4294967280 }
 0x110   :  { %208 = vsyncpa [#allocation4], 1 }

</bundles_post_ra>
